<compile_context>
chip_gen: v5e
topology: v5e:2x2
jax: 0.10.0
libtpu: 0.0.40
codegen_flags: <defaults>
</compile_context>

<pallas_src>
import functools
import math

import jax
import jax.numpy as jnp
from jax import lax
from jax.experimental import pallas as pl
from jax.experimental.pallas import tpu as pltpu

_EPS_COS = 1e-8   # matches torch.nn.functional.cosine_similarity default eps
_EPS_ADD = 1e-6   # matches the `cos_diff + 1e-6` in get_cossim


def _ge2e_kernel(wb_ref, x_ref, ct_ref, csq_ref, out_ref, *, M):
    """One speaker-aligned row tile.

    x_ref:   (TR, D_pad)      utterance embeddings, speaker-major rows, TR % M == 0
    ct_ref:  (D_pad, N_pad)   centroids, pre-transposed, zero-padded columns
    csq_ref: (1, N_pad)       squared centroid norms (zero for padded columns)
    out_ref: (TR, N_pad)      w * cossim + b  (padded columns are don't-care)
    """
    w = wb_ref[0]
    b = wb_ref[1]
    X = x_ref[...]                                           # (TR, Dp) f32
    TR = X.shape[0]
    Np = csq_ref.shape[1]
    eps_sq = _EPS_COS * _EPS_COS

    # Reciprocal norms via rsqrt (EUP). Clamping the squared norm at eps^2 is
    # exactly equivalent to clamping the norm at eps before dividing.
    x_sq = jnp.sum(X * X, axis=-1, keepdims=True)            # (TR, 1)
    inv_x = lax.rsqrt(jnp.maximum(x_sq, eps_sq))             # (TR, 1)
    c_sq = csq_ref[...]                                      # (1, Np)
    inv_c = lax.rsqrt(jnp.maximum(c_sq, eps_sq))             # (1, Np)

    # Single un-normalized MXU matmul: S[r, k] = X[r] . centroid[k].
    S = jnp.dot(X, ct_ref[...], preferred_element_type=jnp.float32)  # (TR, Np)

    # cos_diff: scale the (TR, Np) result instead of pre-normalizing operands.
    cos_diff = S * inv_x * inv_c                              # (TR, Np)

    # Same-speaker mask: column k is "same" iff k == global_row // M.
    # Built with compares only (no integer division); padded columns (k >= N)
    # and padded rows never satisfy 0 <= d < M for a real pairing that matters.
    row0 = pl.program_id(0) * TR
    rows = row0 + lax.broadcasted_iota(jnp.int32, (TR, Np), 0)
    cols = lax.broadcasted_iota(jnp.int32, (TR, Np), 1)
    d = rows - cols * M
    same = jnp.logical_and(d >= 0, d < M)                     # (TR, Np) bool

    # Per-row own-speaker picks from already materialized (TR, Np) data.
    S_same = jnp.sum(jnp.where(same, S, 0.0), axis=-1, keepdims=True)     # (TR,1)
    csq_same = jnp.sum(jnp.where(same, c_sq, 0.0), axis=-1, keepdims=True)

    # Leave-one-out centroid algebra: utt = (M*c - X)/(M-1)
    #   X.utt   = (M*S_same - x_sq) / (M-1)
    #   |utt|^2 = (M^2*c_sq_same - 2M*S_same + x_sq) / (M-1)^2
    inv_m1 = 1.0 / (M - 1)
    fM = float(M)
    x_dot_utt = (fM * S_same - x_sq) * inv_m1                 # (TR, 1)
    utt_sq = (fM * fM * csq_same - 2.0 * fM * S_same + x_sq) * (inv_m1 * inv_m1)
    inv_u = lax.rsqrt(jnp.maximum(utt_sq, eps_sq))            # (TR, 1)
    cos_same = x_dot_utt * (inv_x * inv_u)                    # (TR, 1)

    # sim = w * (where(same, cos_same, cos_diff) + 1e-6) + b, eps folded in.
    cossim = jnp.where(same, cos_same, cos_diff)
    out_ref[...] = (w * cossim + (b + w * _EPS_ADD)).astype(out_ref.dtype)


def _round_up(x, m):
    return -(-x // m) * m


def _choose_row_tile(R_pad, M, target=1024):
    """Largest speaker- and sublane-aligned row tile that divides R_pad,
    stays <= target, and leaves >= 2 grid steps when possible (v7x megacore)."""
    base = (8 * M) // math.gcd(8, M)          # lcm(8, M); divides R_pad by construction
    n = R_pad // base
    max_units = n // 2 if n >= 2 else 1       # force >= 2 grid steps when possible
    best = 1
    for t in range(1, max_units + 1):
        if n % t == 0 and t * base <= max(target, base):
            best = t
    return best * base


def ge2e_loss_forward(X, w, b):
    """X: (N, M, D) float32; w, b scalars. Returns (N, M, N) float32."""
    N, M, D = X.shape
    if M < 2:
        raise ValueError("GE2E leave-one-out centroids require M >= 2 utterances")
    Xf32 = jnp.asarray(X, jnp.float32)
    R = N * M
    base = (8 * M) // math.gcd(8, M)          # lcm(8, M)
    R_pad = _round_up(R, base)                # keep speaker + sublane alignment
    D_pad = _round_up(D, 128)                 # lane-dense contraction dim
    N_pad = _round_up(N, 128)                 # lane-dense output -> unmasked vst

    # Speaker-major rows, zero-padded (zero padding does not change norms/dots).
    Xf = jnp.pad(Xf32.reshape(R, D), ((0, R_pad - R), (0, D_pad - D)))

    # Tiny per-speaker reductions hoisted to the wrapper (done once, not per tile).
    centroids = jnp.mean(Xf32, axis=1)                               # (N, D)
    c_sq = jnp.sum(centroids * centroids, axis=-1)                   # (N,)
    Ct = jnp.pad(centroids, ((0, N_pad - N), (0, D_pad - D))).T      # (D_pad, N_pad)
    csq = jnp.pad(c_sq, (0, N_pad - N)).reshape(1, N_pad)            # (1, N_pad)

    wb = jnp.stack([jnp.asarray(w, jnp.float32), jnp.asarray(b, jnp.float32)])

    TR = _choose_row_tile(R_pad, M)
    grid = (R_pad // TR,)
    # VMEM footprint (double-buffered X tile + output tile + small operands)
    # stays far below the scoped default at these sizes; no vmem_limit needed.
    out2d = pl.pallas_call(
        functools.partial(_ge2e_kernel, M=M),
        out_shape=jax.ShapeDtypeStruct((R_pad, N_pad), jnp.float32),
        grid=grid,
        in_specs=[
            pl.BlockSpec(memory_space=pltpu.MemorySpace.SMEM),       # [w, b] scalars
            pl.BlockSpec((TR, D_pad), lambda i: (i, 0)),             # utterance rows
            pl.BlockSpec((D_pad, N_pad), lambda i: (0, 0)),          # centroids^T
            pl.BlockSpec((1, N_pad), lambda i: (0, 0)),              # centroid |c|^2
        ],
        out_specs=pl.BlockSpec((TR, N_pad), lambda i: (i, 0)),
        compiler_params=pltpu.CompilerParams(
            dimension_semantics=("parallel",)),
    )(wb, Xf, Ct, csq)
    return out2d[:R, :N].reshape(N, M, N)


def _reference(X, w, b):
    """Pure-JAX mirror of the PyTorch GE2ELoss forward for validation."""
    N, M, D = X.shape
    sum_c = X.sum(axis=1)
    centroids = sum_c / M
    utt_c = (sum_c[:, None, :] - X) / (M - 1)

    def cos(a, bb):
        na = jnp.maximum(jnp.linalg.norm(a, axis=-1), _EPS_COS)
        nb = jnp.maximum(jnp.linalg.norm(bb, axis=-1), _EPS_COS)
        return jnp.sum(a * bb, axis=-1) / (na * nb)

    cos_same = cos(X, utt_c)                                         # (N, M)
    cos_diff = cos(X[:, :, None, :], centroids[None, None, :, :])    # (N, M, N)
    spk = jnp.arange(N)[:, None, None]
    cen = jnp.arange(N)[None, None, :]
    cossim = jnp.where(spk == cen, cos_same[:, :, None], cos_diff) + _EPS_ADD
    return w * cossim + b


if __name__ == "__main__":
    # Deterministic parameters as in the module __init__: w=10.0, b=-5.0.
    w_param = 10.0
    b_param = -5.0

    # Small GE2E batch: 4 speakers, 6 utterances each, 32-dim embeddings.
    N, M, D = 4, 6, 32
    key = jax.random.PRNGKey(0)
    X = jax.random.normal(key, (N, M, D), dtype=jnp.float32)

    out = ge2e_loss_forward(X, w_param, b_param)
    out = jax.block_until_ready(out)

    ref = _reference(X, w_param, b_param)
    assert out.shape == (N, M, N)
    err = jnp.max(jnp.abs(out - ref))
    assert jnp.allclose(out, ref, atol=1e-3, rtol=1e-3), f"max abs err {err}"
    print("KERNEL_OK")
</pallas_src>

<mosaic_0001>
module attributes {stable_mosaic.version = 11 : i64} {
  func.func @_ge2e_kernel(%arg0: i32, %arg1: memref<2xf32, #tpu.memory_space<smem>>, %arg2: memref<24x128xf32, #tpu.memory_space<vmem>>, %arg3: memref<128x128xf32, #tpu.memory_space<vmem>>, %arg4: memref<1x128xf32, #tpu.memory_space<vmem>>, %arg5: memref<24x128xf32, #tpu.memory_space<vmem>>) attributes {dimension_semantics = [#tpu.dimension_semantics<parallel>], iteration_bounds = array<i64: 1>, scalar_prefetch = 0 : i64, scratch_operands = 0 : i64, tpu.core_type = #tpu.core_type<tc>, window_params = [{transform_indices = @transform_0, window_bounds = array<i64: 2>}, {transform_indices = @transform_1, window_bounds = array<i64: 24, 128>}, {pipeline_mode = #tpu.pipeline_mode<synchronous>, transform_indices = @transform_2, window_bounds = array<i64: 128, 128>}, {pipeline_mode = #tpu.pipeline_mode<synchronous>, transform_indices = @transform_3, window_bounds = array<i64: 1, 128>}, {transform_indices = @transform_4, window_bounds = array<i64: 24, 128>}]} {
    %c0 = arith.constant 0 : index
    %0 = memref.load %arg1[%c0] : memref<2xf32, #tpu.memory_space<smem>>
    %c1 = arith.constant 1 : index
    %1 = memref.load %arg1[%c1] : memref<2xf32, #tpu.memory_space<smem>>
    %c0_0 = arith.constant 0 : index
    %c0_1 = arith.constant 0 : index
    %2 = vector.load %arg2[%c0_0, %c0_1] : memref<24x128xf32, #tpu.memory_space<vmem>>, vector<24x128xf32>
    %3 = arith.mulf %2, %2 : vector<24x128xf32>
    %cst = arith.constant dense<0.000000e+00> : vector<24xf32>
    %4 = vector.multi_reduction <add>, %3, %cst [1] : vector<24x128xf32> to vector<24xf32>
    %5 = vector.shape_cast %4 : vector<24xf32> to vector<24x1xf32>
    %cst_2 = arith.constant 1.000000e-16 : f32
    %6 = vector.broadcast %cst_2 : f32 to vector<24x1xf32>
    %7 = arith.maximumf %5, %6 : vector<24x1xf32>
    %8 = math.rsqrt %7 : vector<24x1xf32>
    %c0_3 = arith.constant 0 : index
    %c0_4 = arith.constant 0 : index
    %9 = vector.load %arg4[%c0_3, %c0_4] : memref<1x128xf32, #tpu.memory_space<vmem>>, vector<1x128xf32>
    %cst_5 = arith.constant 1.000000e-16 : f32
    %10 = vector.broadcast %cst_5 : f32 to vector<1x128xf32>
    %11 = arith.maximumf %9, %10 : vector<1x128xf32>
    %12 = math.rsqrt %11 : vector<1x128xf32>
    %c0_6 = arith.constant 0 : index
    %c0_7 = arith.constant 0 : index
    %13 = vector.load %arg3[%c0_6, %c0_7] : memref<128x128xf32, #tpu.memory_space<vmem>>, vector<128x128xf32>
    %cst_8 = arith.constant dense<0.000000e+00> : vector<24x128xf32>
    %14 = tpu.matmul %2, %13, %cst_8 {dimension_numbers = #tpu.dot_dimension_numbers<[1], [0], [0], [1], [0, 0, 1, 1], [], []>} : vector<24x128xf32>, vector<128x128xf32>, vector<24x128xf32> -> vector<24x128xf32>
    %15 = vector.broadcast %8 : vector<24x1xf32> to vector<24x128xf32>
    %16 = arith.mulf %14, %15 : vector<24x128xf32>
    %17 = vector.broadcast %12 : vector<1x128xf32> to vector<24x128xf32>
    %18 = arith.mulf %16, %17 : vector<24x128xf32>
    %c24_i32 = arith.constant 24 : i32
    %19 = arith.muli %arg0, %c24_i32 : i32
    %20 = tpu.iota {dimensions = array<i32: 0>} : vector<24x128xi32>
    %21 = vector.broadcast %19 : i32 to vector<24x128xi32>
    %22 = arith.addi %21, %20 : vector<24x128xi32>
    %23 = tpu.iota {dimensions = array<i32: 1>} : vector<24x128xi32>
    %c6_i32 = arith.constant 6 : i32
    %24 = vector.broadcast %c6_i32 : i32 to vector<24x128xi32>
    %25 = arith.muli %23, %24 : vector<24x128xi32>
    %26 = arith.subi %22, %25 : vector<24x128xi32>
    %c0_i32 = arith.constant 0 : i32
    %27 = vector.broadcast %c0_i32 : i32 to vector<24x128xi32>
    %28 = arith.cmpi sge, %26, %27 : vector<24x128xi32>
    %c6_i32_9 = arith.constant 6 : i32
    %29 = vector.broadcast %c6_i32_9 : i32 to vector<24x128xi32>
    %30 = arith.cmpi slt, %26, %29 : vector<24x128xi32>
    %31 = arith.andi %28, %30 : vector<24x128xi1>
    %cst_10 = arith.constant 0.000000e+00 : f32
    %32 = vector.broadcast %cst_10 : f32 to vector<24x128xf32>
    %33 = arith.select %31, %14, %32 : vector<24x128xi1>, vector<24x128xf32>
    %cst_11 = arith.constant dense<0.000000e+00> : vector<24xf32>
    %34 = vector.multi_reduction <add>, %33, %cst_11 [1] : vector<24x128xf32> to vector<24xf32>
    %35 = vector.shape_cast %34 : vector<24xf32> to vector<24x1xf32>
    %cst_12 = arith.constant 0.000000e+00 : f32
    %36 = vector.shape_cast %9 : vector<1x128xf32> to vector<1x128xf32>
    %37 = vector.broadcast %36 : vector<1x128xf32> to vector<24x128xf32>
    %38 = vector.broadcast %cst_12 : f32 to vector<24x128xf32>
    %39 = arith.select %31, %37, %38 : vector<24x128xi1>, vector<24x128xf32>
    %cst_13 = arith.constant dense<0.000000e+00> : vector<24xf32>
    %40 = vector.multi_reduction <add>, %39, %cst_13 [1] : vector<24x128xf32> to vector<24xf32>
    %41 = vector.shape_cast %40 : vector<24xf32> to vector<24x1xf32>
    %cst_14 = arith.constant 6.000000e+00 : f32
    %42 = vector.broadcast %cst_14 : f32 to vector<24x1xf32>
    %43 = arith.mulf %42, %35 : vector<24x1xf32>
    %44 = arith.subf %43, %5 : vector<24x1xf32>
    %cst_15 = arith.constant 2.000000e-01 : f32
    %45 = vector.broadcast %cst_15 : f32 to vector<24x1xf32>
    %46 = arith.mulf %44, %45 : vector<24x1xf32>
    %cst_16 = arith.constant 3.600000e+01 : f32
    %47 = vector.broadcast %cst_16 : f32 to vector<24x1xf32>
    %48 = arith.mulf %47, %41 : vector<24x1xf32>
    %cst_17 = arith.constant 1.200000e+01 : f32
    %49 = vector.broadcast %cst_17 : f32 to vector<24x1xf32>
    %50 = arith.mulf %49, %35 : vector<24x1xf32>
    %51 = arith.subf %48, %50 : vector<24x1xf32>
    %52 = arith.addf %51, %5 : vector<24x1xf32>
    %cst_18 = arith.constant 4.000000e-02 : f32
    %53 = vector.broadcast %cst_18 : f32 to vector<24x1xf32>
    %54 = arith.mulf %52, %53 : vector<24x1xf32>
    %cst_19 = arith.constant 1.000000e-16 : f32
    %55 = vector.broadcast %cst_19 : f32 to vector<24x1xf32>
    %56 = arith.maximumf %54, %55 : vector<24x1xf32>
    %57 = math.rsqrt %56 : vector<24x1xf32>
    %58 = arith.mulf %8, %57 : vector<24x1xf32>
    %59 = arith.mulf %46, %58 : vector<24x1xf32>
    %60 = vector.shape_cast %59 : vector<24x1xf32> to vector<24x1xf32>
    %61 = vector.broadcast %60 : vector<24x1xf32> to vector<24x128xf32>
    %62 = arith.select %31, %61, %18 : vector<24x128xi1>, vector<24x128xf32>
    %63 = vector.broadcast %0 : f32 to vector<24x128xf32>
    %64 = arith.mulf %63, %62 : vector<24x128xf32>
    %cst_20 = arith.constant 9.99999997E-7 : f32
    %65 = arith.mulf %0, %cst_20 : f32
    %66 = arith.addf %1, %65 : f32
    %67 = vector.broadcast %66 : f32 to vector<24x128xf32>
    %68 = arith.addf %64, %67 : vector<24x128xf32>
    %c0_21 = arith.constant 0 : index
    %c0_22 = arith.constant 0 : index
    %69 = vector.load %arg5[%c0_21, %c0_22] : memref<24x128xf32, #tpu.memory_space<vmem>>, vector<24x128xf32>
    tpu.vector_store %arg5[%c0_21, %c0_22], %68 {strides = array<i32>} : memref<24x128xf32, #tpu.memory_space<vmem>>, vector<24x128xf32>,
    return
  }
  func.func @transform_0(%arg0: i32) -> i32 {
    %c0_i32 = arith.constant 0 : i32
    %c0_i32_0 = arith.constant 0 : i32
    return %c0_i32 : i32
  }
  func.func @transform_1(%arg0: i32) -> (i32, i32) {
    %c0_i32 = arith.constant 0 : i32
    %c0_i32_0 = arith.constant 0 : i32
    return %arg0, %c0_i32 : i32, i32
  }
  func.func @transform_2(%arg0: i32) -> (i32, i32) {
    %c0_i32 = arith.constant 0 : i32
    %c0_i32_0 = arith.constant 0 : i32
    %c0_i32_1 = arith.constant 0 : i32
    return %c0_i32, %c0_i32_0 : i32, i32
  }
  func.func @transform_3(%arg0: i32) -> (i32, i32) {
    %c0_i32 = arith.constant 0 : i32
    %c0_i32_0 = arith.constant 0 : i32
    %c0_i32_1 = arith.constant 0 : i32
    return %c0_i32, %c0_i32_0 : i32, i32
  }
  func.func @transform_4(%arg0: i32) -> (i32, i32) {
    %c0_i32 = arith.constant 0 : i32
    %c0_i32_0 = arith.constant 0 : i32
    return %arg0, %c0_i32 : i32, i32
  }
}

</mosaic_0001>

<bundles_post_ra>
// kernel: tpu_custom_call.1
= control target key start
LH: loop header
LB: loop body
LE: loop exit
PB: predicated region body
PF: predicated region fallthrough
CT: control target
= control target key end

     0   :  { %9 = vsyncpa [#allocation5], 0  ;;  %s637_s0 = inlined_call_operand.hbm [shape: f32[2], index: 0, kind: input, shape index: {}]   ;;  %s638_s1 = inlined_call_operand.hbm [shape: f32[24,128], index: 1, kind: input, shape index: {}]   ;;  %s639_s2 = inlined_call_operand.hbm [shape: f32[128,128], index: 2, kind: input, shape index: {}]   ;;  %s640_s3 = inlined_call_operand.vmem [shape: f32[1,128], index: 3, kind: input, shape index: {}]   ;;  %s641_s4 = inlined_call_operand.hbm [shape: f32[24,128], index: 4, kind: output, shape index: {}]  }
   0x1   :  { %10 = vsyncpa [#allocation3], 0 }
   0x2   :  { %11 = vsyncpa [#allocation8], 0 }
   0x3   :  { %12 = vsyncpa [#allocation4], 0  ;;  %s18_s17 = sshll.u32 %s637_s0, 4  ;;  %s26_s20 = sshll.u32 %s638_s1, 4  ;;  %s19_s17 = int_to_ptr.hbm [resolvable:$true] %s18_s17  ;;  %s27_s20 = int_to_ptr.hbm [resolvable:$true] %s26_s20 }
   0x4   :  { %s464_s21 = smov [#allocation2]   ;;  %s465_s22 = smov [#allocation6]  }
   0x5   :  { %21 = dma.hbm_to_smem %s19_s17, 16, %s464_s21, [#allocation5]  }
   0x6   :  { %s28_s23 = sshll.u32 %s465_s22, 4  ;;  %s466_s24 = smov 128   ;;  %s29_s23 = int_to_ptr.vmem [resolvable:$true] %s28_s23 }
   0x7   :  { %s467_s25 = smov 8   ;;  %s39_s0 = sshll.u32 %s639_s2, 4  ;;  %s40_s0 = int_to_ptr.hbm [resolvable:$true] %s39_s0 }
   0x8   :  { %34 = dma.hbm_to_vmem [thread:$0]  %s27_s20, 384, %s29_s23, [#allocation3], %s466_s24, %s466_s24, %s467_s25  }
   0x9   :  { %s468_s28 = smov [#allocation7]  }
   0xa   :  { %s41_s29 = sshll.u32 %s468_s28, 4  ;;  %s42_s29 = int_to_ptr.vmem [resolvable:$true] %s41_s29 }
   0xb   :  { %47 = dma.hbm_to_vmem [thread:$0]  %s40_s0, 2048, %s42_s29, [#allocation8], %s466_s24, %s466_s24, %s467_s25  }
   0xc   :  { %456 = dma.done.wait [#allocation5], 16  }
   0xd   :  { %457 = vsyncadd [#allocation5], 4294967280 }
   0xe   :  { %458 = dma.done.wait [#allocation3], 384  }
   0xf   :  { %459 = vsyncadd [#allocation3], 4294966912 }
  0x10   :  { %460 = dma.done.wait [#allocation8], 2048  }
  0x11   :  { %461 = vsyncadd [#allocation8], 4294965248 }
  0x12   :  { %62 = sfence }
  0x13   :  { %v137_v0 = vld [vmem:[#allocation7 + $0x78] sm:$0xff]  ;;  %v136_v1 = vld [vmem:[#allocation7 + $0x70] sm:$0xff]  ;;  %v174_v2 = vlaneseq  ;;  %v135_v3 = vld [vmem:[#allocation7 + $0x68] sm:$0xff]  ;;  %s603_s6 = sld [smem:[#allocation2 + $0x1]]  ;;  %s469_s9 = smov [#allocation9]  }
  0x14   :  { %138 = vmatpush.msra.mxu0 %v137_v0  ;;  %320 = vmatpush.msra.mxu2 %v137_v0  ;;  %v134_v6 = vld [vmem:[#allocation7 + $0x60] sm:$0xff]  ;;  %v133_v10 = vld [vmem:[#allocation7 + $0x58] sm:$0xff]  ;;  %v520_v12 = vld [vmem:[%s640_s3] ss:$0 sm:$0xff]  ;;  %s301_s10 = sshll.u32 %s469_s9, 4  ;;  %s303_s13 = sshll.u32 %s641_s4, 4  ;;  %s302_s10 = int_to_ptr.vmem [resolvable:$true] %s301_s10  ;;  %s304_s13 = int_to_ptr.hbm [resolvable:$true] %s303_s13 }
  0x15   :  { %319 = vmatpush.msra.mxu1 %v137_v0  ;;  %v510_v4 = vshrl.u32 %v174_v2, 7  ;;  %v183_v5 = vand.u32 127, %v174_v2  ;;  %v132_v14 = vld [vmem:[#allocation7 + $0x50] sm:$0xff]  ;;  %v131_v16 = vld [vmem:[#allocation7 + $0x48] sm:$0xff]  ;;  %v130_v18 = vld [vmem:[#allocation7 + $0x40] sm:$0xff] }
  0x16   :  { %139 = vmatpush.msra.mxu0 %v136_v1  ;;  %322 = vmatpush.msra.mxu2 %v136_v1  ;;  %v129_v19 = vld [vmem:[#allocation7 + $0x38] sm:$0xff]  ;;  %v128_v21 = vld [vmem:[#allocation7 + $0x30] sm:$0xff]  ;;  %v127_v23 = vld [vmem:[#allocation7 + $0x28] sm:$0xff] }
  0x17   :  { %321 = vmatpush.msra.mxu1 %v136_v1  ;;  %v176_v7 = vadd.s32 8, %v510_v4  ;;  %v513_v8 = vmul.u32 6, %v183_v5  ;;  %v177_v9 = vadd.s32 16, %v510_v4  ;;  %v126_v24 = vld [vmem:[#allocation7 + $0x20] sm:$0xff]  ;;  %v67_v25 = vld [vmem:[#allocation6 + $0x10] sm:$0xff]  ;;  %v124_v27 = vld [vmem:[#allocation7 + $0x10] sm:$0xff] }
  0x18   :  { %140 = vmatpush.msra.mxu0 %v135_v3  ;;  %324 = vmatpush.msra.mxu2 %v135_v3  ;;  %v125_v26 = vld [vmem:[#allocation7 + $0x18] sm:$0xff]  ;;  %v70_v28 = vmul.f32 %v67_v25, %v67_v25  ;;  %v123_v29 = vld [vmem:[#allocation7 + $0x8] sm:$0xff]  ;;  %v122_v30 = vld [vmem:[#allocation7] sm:$0xff] }
  0x19   :  { %323 = vmatpush.msra.mxu1 %v135_v3  ;;  %v186_v11 = vsub.s32 %v176_v7, %v513_v8  ;;  %v187_v13 = vsub.s32 %v177_v9, %v513_v8  ;;  %v65_v31 = vld [vmem:[#allocation6] sm:$0xff]  ;;  %v66_v32 = vld [vmem:[#allocation6 + $0x8] sm:$0xff]  ;;  %v185_v33 = vsub.s32 %v510_v4, %v513_v8 }
  0x1a   :  { %141 = vmatpush.msra.mxu0 %v134_v6  ;;  %326 = vmatpush.msra.mxu2 %v134_v6  ;;  %v69_v42 = vmul.f32 %v66_v32, %v66_v32  ;;  %v68_v43 = vmul.f32 %v65_v31, %v65_v31  ;;  %v110_v46 = vld [vmem:[%s640_s3] sm:$0x1]  ;;  %s591_s3 = sld [smem:[#allocation2]] }
  0x1b   :  { %vm189_vm0 = vcmp.ge.s32.totalorder %v186_v11, 0  ;;  %vm192_vm1 = vcmp.lt.s32.totalorder %v186_v11, 6  ;;  %325 = vmatpush.msra.mxu1 %v134_v6  ;;  %vm190_vm3 = vcmp.ge.s32.totalorder %v187_v13, 0  ;;  %vm193_vm4 = vcmp.lt.s32.totalorder %v187_v13, 6 }
  0x1c   :  { %142 = vmatpush.msra.mxu0 %v133_v10  ;;  %328 = vmatpush.msra.mxu2 %v133_v10  ;;  %vm523_vm2 = vmand %vm189_vm0, %vm192_vm1  ;;  %vm188_vm6 = vcmp.ge.s32.totalorder %v185_v33, 0  ;;  %vm191_vm7 = vcmp.lt.s32.totalorder %v185_v33, 6  ;;  %v111_v48 = vmax.f32 %v110_v46, 1e-16 }
  0x1d   :  { %v210_v17 = vsel %vm523_vm2, %v520_v12, 0.0  ;;  %327 = vmatpush.msra.mxu1 %v133_v10  ;;  %vm530_vm5 = vmand %vm190_vm3, %vm193_vm4 }
  0x1e   :  { %143 = vmatpush.msra.mxu0 %v132_v14  ;;  %330 = vmatpush.msra.mxu2 %v132_v14  ;;  %v211_v22 = vsel %vm530_vm5, %v520_v12, 0.0  ;;  %vm539_vm8 = vmand %vm188_vm6, %vm191_vm7  ;;  %358 = vrsqrt.f32 %v111_v48  ;;  %vm118_vm9 = vweird.f32 %v111_v48 }
  0x1f   :  { %214 = vadd.xlane.f32.xlu2 %v210_v17  ;;  %329 = vmatpush.msra.mxu1 %v132_v14  ;;  %v209_v35 = vsel %vm539_vm8, %v520_v12, 0.0 }
  0x20   :  { %144 = vmatpush.msra.mxu0 %v131_v16  ;;  %332 = vmatpush.msra.mxu2 %v131_v16  ;;  %s288_s7 = smul.f32 1e-06, %s591_s3 }
  0x21   :  { %331 = vmatpush.msra.mxu1 %v131_v16  ;;  %212 = vadd.xlane.f32.xlu1 %v209_v35 }
  0x22   :  { %145 = vmatpush.msra.mxu0 %v130_v18  ;;  %334 = vmatpush.msra.mxu2 %v130_v18  ;;  %s289_s8 = sadd.f32 %s603_s6, %s288_s7 }
  0x23   :  { %333 = vmatpush.msra.mxu1 %v130_v18 }
  0x24   :  { %146 = vmatpush.msra.mxu0 %v129_v19  ;;  %336 = vmatpush.msra.mxu2 %v129_v19  ;;  %v359_v51 = vpop.eup %358 }
  0x25   :  { %335 = vmatpush.msra.mxu1 %v129_v19  ;;  %v113_v53 = vmul.f32 %v359_v51, %v111_v48  ;;  %vm119_vm10 = vweird.f32 %v359_v51 }
  0x26   :  { %147 = vmatpush.msra.mxu0 %v128_v21  ;;  %338 = vmatpush.msra.mxu2 %v128_v21  ;;  %vm579_vm13 = vmor %vm118_vm9, %vm119_vm10 }
  0x27   :  { %216 = vadd.xlane.f32.xlu2 %v211_v22  ;;  %337 = vmatpush.msra.mxu1 %v128_v21  ;;  %v114_v56 = vmul.f32 %v359_v51, %v113_v53 }
  0x28   :  { %148 = vmatpush.msra.mxu0 %v127_v23  ;;  %340 = vmatpush.msra.mxu2 %v127_v23 }
  0x29   :  { %339 = vmatpush.msra.mxu1 %v127_v23  ;;  %v115_v61 = vmul.f32 0.5, %v114_v56 }
  0x2a   :  { %149 = vmatpush.msra.mxu0 %v126_v24  ;;  %342 = vmatpush.msra.mxu2 %v126_v24 }
  0x2b   :  { %341 = vmatpush.msra.mxu1 %v126_v24  ;;  %v116_v4 = vsub.f32 1.5, %v115_v61 }
  0x2c   :  { %150 = vmatpush.msra.mxu0 %v125_v26  ;;  %344 = vmatpush.msra.mxu2 %v125_v26 }
  0x2d   :  { %343 = vmatpush.msra.mxu1 %v125_v26  ;;  %v117_v16 = vmul.f32 %v359_v51, %v116_v4 }
  0x2e   :  { %151 = vmatpush.msra.mxu0 %v124_v27  ;;  %346 = vmatpush.msra.mxu2 %v124_v27 }
  0x2f   :  { %75 = vadd.xlane.f32.xlu2 %v70_v28  ;;  %345 = vmatpush.msra.mxu1 %v124_v27  ;;  %v121_v27 = vsel %vm579_vm13, %v359_v51, %v117_v16 }
  0x30   :  { %152 = vmatpush.msra.mxu0 %v123_v29  ;;  %348 = vmatpush.msra.mxu2 %v123_v29  ;;  %v599_v35 = vperm.slane %v121_v27, 0 }
  0x31   :  { %347 = vmatpush.msra.mxu1 %v123_v29 }
  0x32   :  { %153 = vmatpush.msra.mxu0 %v122_v30  ;;  %350 = vmatpush.msra.mxu2 %v122_v30 }
  0x33   :  { %154 = vmatmul.f32.vlgmr.msra.gmra.mxu0 %v65_v31  ;;  %160 = vmatmul.f32.vlgmr.msra.gmra.mxu2 %v67_v25 }
  0x34   :  { %349 = vmatpush.msra.mxu1 %v122_v30 }
  0x35   :  { %157 = vmatmul.f32.vlgmr.msra.gmra.mxu1 %v66_v32 }
  0x92   :  { %v215_v44 = vpop.xlane.xlu2 %214 }
  0x93   :  { %v228_v2 = vmul.f32 36.0, %v215_v44 }
  0x94   :  { %v213_v50 = vpop.xlane.xlu1 %212 }
  0x95   :  { %v227_v5 = vmul.f32 36.0, %v213_v50 }
  0x9a   :  { %v217_v45 = vpop.xlane.xlu2 %216 }
  0x9b   :  { %v229_v57 = vmul.f32 36.0, %v217_v45 }
  0xa2   :  { %v564_v47 = vpop.xlane.xlu2 %75 }
  0xa3   :  { %v79_v49 = vmax.f32 %v564_v47, 1e-16 }
  0xa5   :  { %360 = vrsqrt.f32 %v79_v49  ;;  %vm106_vm11 = vweird.f32 %v79_v49 }
  0xab   :  { %v361_v52 = vpop.eup %360 }
  0xac   :  { %v101_v55 = vmul.f32 %v361_v52, %v79_v49  ;;  %vm107_vm12 = vweird.f32 %v361_v52 }
  0xad   :  { %vm108_vm14 = vmor %vm106_vm11, %vm107_vm12 }
  0xae   :  { %v102_v58 = vmul.f32 %v361_v52, %v101_v55 }
  0xb0   :  { %v546_v36 = vpop.f32.mrf.mxu0  ;;  %v103_v1 = vmul.f32 0.5, %v102_v58 }
  0xb1   :  { %v197_v37 = vsel %vm539_vm8, %v546_v36, 0.0 }
  0xb2   :  { %200 = vadd.xlane.f32.xlu0 %v197_v37  ;;  %v551_v38 = vpop.f32.mrf.mxu1  ;;  %v104_v9 = vsub.f32 1.5, %v103_v1 }
  0xb3   :  { %v198_v41 = vsel %vm523_vm2, %v551_v38, 0.0 }
  0xb4   :  { %v105_v18 = vmul.f32 %v361_v52, %v104_v9 }
  0xb6   :  { %v553_v39 = vpop.f32.mrf.mxu2  ;;  %v109_v26 = vsel %vm108_vm14, %v361_v52, %v105_v18 }
  0xb7   :  { %v199_v40 = vsel %vm530_vm5, %v553_v39, 0.0  ;;  %v166_v33 = vmul.f32 %v553_v39, %v109_v26 }
  0xb8   :  { %204 = vadd.xlane.f32.xlu1 %v199_v40 }
  0xb9   :  { %v172_v39 = vmul.f32 %v599_v35, %v166_v33 }
  0xba   :  { %202 = vadd.xlane.f32.xlu0 %v198_v41 }
  0xc0   :  { %73 = vadd.xlane.f32.xlu1 %v69_v42 }
  0xc2   :  { %71 = vadd.xlane.f32.xlu0 %v68_v43 }
 0x125   :  { %v567_v54 = vpop.xlane.xlu0 %200 }
 0x126   :  { %v230_v6 = vmul.f32 12.0, %v567_v54 }
 0x128   :  { %v233_v17 = vsub.f32 %v227_v5, %v230_v6  ;;  %v218_v6 = vmul.f32 6.0, %v567_v54 }
 0x12b   :  { %v205_v59 = vpop.xlane.xlu1 %204 }
 0x12c   :  { %v232_v60 = vmul.f32 12.0, %v205_v59  ;;  %v220_v28 = vmul.f32 6.0, %v205_v59 }
 0x12d   :  { %v203_v62 = vpop.xlane.xlu0 %202 }
 0x12e   :  { %v235_v63 = vsub.f32 %v229_v57, %v232_v60  ;;  %v231_v0 = vmul.f32 12.0, %v203_v62  ;;  %v223_v41 = vsub.f32 %v220_v28, %v564_v47  ;;  %v219_v53 = vmul.f32 6.0, %v203_v62 }
 0x130   :  { %v238_v3 = vadd.f32 %v235_v63, %v564_v47  ;;  %v234_v8 = vsub.f32 %v228_v2, %v231_v0  ;;  %v226_v51 = vmul.f32 0.2, %v223_v41 }
 0x132   :  { %v241_v7 = vmul.f32 0.04, %v238_v3 }
 0x133   :  { %v571_v10 = vpop.xlane.xlu1 %73 }
 0x134   :  { %v244_v11 = vmax.f32 %v241_v7, 1e-16  ;;  %v574_v12 = vmax.f32 %v571_v10, 1e-16  ;;  %v237_v13 = vadd.f32 %v234_v8, %v571_v10  ;;  %v222_v59 = vsub.f32 %v219_v53, %v571_v10 }
 0x135   :  { %v577_v14 = vpop.xlane.xlu0 %71  ;;  %v284_v8 = vstv %s591_s3 }
 0x136   :  { %362 = vrsqrt.f32 %v244_v11  ;;  %v240_v21 = vmul.f32 0.04, %v237_v13  ;;  %v585_v22 = vmax.f32 %v577_v14, 1e-16  ;;  %v236_v23 = vadd.f32 %v233_v17, %v577_v14 }
 0x137   :  { %364 = vrsqrt.f32 %v574_v12  ;;  %vm271_vm1 = vweird.f32 %v244_v11  ;;  %vm96_vm4 = vweird.f32 %v574_v12  ;;  %v225_v17 = vmul.f32 0.2, %v222_v59 }
 0x138   :  { %v588_v24 = vmax.f32 %v240_v21, 1e-16  ;;  %366 = vrsqrt.f32 %v585_v22  ;;  %v239_v25 = vmul.f32 0.04, %v236_v23  ;;  %vm86_vm10 = vweird.f32 %v585_v22 }
 0x139   :  { %v221_v54 = vsub.f32 %v218_v6, %v577_v14 }
 0x13a   :  { %368 = vrsqrt.f32 %v588_v24  ;;  %v596_v30 = vmax.f32 %v239_v25, 1e-16  ;;  %vm261_vm11 = vweird.f32 %v588_v24 }
 0x13b   :  { %v224_v28 = vmul.f32 0.2, %v221_v54 }
 0x13c   :  { %v363_v29 = vpop.eup %362  ;;  %370 = vrsqrt.f32 %v596_v30 }
 0x13d   :  { %v365_v31 = vpop.eup %364  ;;  %v266_v32 = vmul.f32 %v363_v29, %v244_v11  ;;  %vm272_vm15 = vweird.f32 %v363_v29  ;;  %v290_v11 = vstv %s289_s8 }
 0x13e   :  { %v91_v37 = vmul.f32 %v365_v31, %v574_v12  ;;  %v367_v40 = vpop.eup %366  ;;  %vm97_vm0 = vweird.f32 %v365_v31  ;;  %vm273_vm3 = vmor %vm271_vm1, %vm272_vm15  ;;  %vm251_vm15 = vweird.f32 %v596_v30 }
 0x13f   :  { %v267_v42 = vmul.f32 %v363_v29, %v266_v32  ;;  %v81_v44 = vmul.f32 %v367_v40, %v585_v22  ;;  %vm98_vm6 = vmor %vm96_vm4, %vm97_vm0  ;;  %vm87_vm9 = vweird.f32 %v367_v40 }
 0x140   :  { %v92_v43 = vmul.f32 %v365_v31, %v91_v37  ;;  %v369_v45 = vpop.eup %368  ;;  %vm88_vm12 = vmor %vm86_vm10, %vm87_vm9 }
 0x141   :  { %v268_v46 = vmul.f32 0.5, %v267_v42  ;;  %v256_v49 = vmul.f32 %v369_v45, %v588_v24  ;;  %v82_v50 = vmul.f32 %v367_v40, %v81_v44  ;;  %vm262_vm7 = vweird.f32 %v369_v45 }
 0x142   :  { %v93_v48 = vmul.f32 0.5, %v92_v43  ;;  %v371_v55 = vpop.eup %370  ;;  %vm263_vm13 = vmor %vm261_vm11, %vm262_vm7 }
 0x143   :  { %v269_v52 = vsub.f32 1.5, %v268_v46  ;;  %v257_v56 = vmul.f32 %v369_v45, %v256_v49  ;;  %v83_v57 = vmul.f32 0.5, %v82_v50  ;;  %v246_v60 = vmul.f32 %v371_v55, %v596_v30 }
 0x144   :  { %v94_v47 = vsub.f32 1.5, %v93_v48  ;;  %vm252_vm14 = vweird.f32 %v371_v55 }
 0x145   :  { %v270_v58 = vmul.f32 %v363_v29, %v269_v52  ;;  %v258_v63 = vmul.f32 0.5, %v257_v56  ;;  %v84_v0 = vsub.f32 1.5, %v83_v57  ;;  %v247_v1 = vmul.f32 %v371_v55, %v246_v60  ;;  %vm253_vm0 = vmor %vm251_vm15, %vm252_vm14 }
 0x146   :  { %v95_v61 = vmul.f32 %v365_v31, %v94_v47 }
 0x147   :  { %v274_v62 = vsel %vm273_vm3, %v363_v29, %v270_v58  ;;  %v259_v4 = vsub.f32 1.5, %v258_v63  ;;  %v85_v5 = vmul.f32 %v367_v40, %v84_v0  ;;  %v248_v7 = vmul.f32 0.5, %v247_v1 }
 0x148   :  { %v277_v2 = vmul.f32 %v274_v62, %v109_v26  ;;  %v99_v3 = vsel %vm98_vm6, %v365_v31, %v95_v61 }
 0x149   :  { %v260_v10 = vmul.f32 %v369_v45, %v259_v4  ;;  %v165_v12 = vmul.f32 %v551_v38, %v99_v3  ;;  %v89_v13 = vsel %vm88_vm12, %v367_v40, %v85_v5  ;;  %v249_v16 = vsub.f32 1.5, %v248_v7 }
 0x14a   :  { %v280_v9 = vmul.f32 %v277_v2, %v226_v51  ;;  %v164_v24 = vmul.f32 %v546_v36, %v89_v13 }
 0x14b   :  { %v264_v18 = vsel %vm263_vm13, %v369_v45, %v260_v10  ;;  %v250_v22 = vmul.f32 %v371_v55, %v249_v16  ;;  %v171_v38 = vmul.f32 %v599_v35, %v165_v12 }
 0x14c   :  { %v283_v19 = vsel %vm530_vm5, %v280_v9, %v172_v39  ;;  %v276_v21 = vmul.f32 %v264_v18, %v99_v3  ;;  %v170_v20 = vmul.f32 %v599_v35, %v164_v24 }
 0x14d   :  { %v287_v23 = vmul.f32 %v284_v8, %v283_v19  ;;  %v254_v26 = vsel %vm253_vm0, %v371_v55, %v250_v22 }
 0x14e   :  { %v279_v25 = vmul.f32 %v276_v21, %v225_v17  ;;  %v275_v29 = vmul.f32 %v254_v26, %v89_v13 }
 0x14f   :  { %v293_v27 = vadd.f32 %v290_v11, %v287_v23 }
 0x150   :  { %v282_v14 = vsel %vm523_vm2, %v279_v25, %v171_v38  ;;  %v278_v31 = vmul.f32 %v275_v29, %v224_v28 }
 0x151   :  { %296 = vst [vmem:[#allocation9 + $0x10] sm:$0xff] %v293_v27  ;;  %v286_v32 = vmul.f32 %v284_v8, %v282_v14 }
 0x152   :  { %v281_v30 = vsel %vm539_vm8, %v278_v31, %v170_v20 }
 0x153   :  { %v292_v36 = vadd.f32 %v290_v11, %v286_v32  ;;  %v285_v33 = vmul.f32 %v284_v8, %v281_v30 }
 0x155   :  { %295 = vst [vmem:[#allocation9 + $0x8] sm:$0xff] %v292_v36  ;;  %v291_v37 = vadd.f32 %v290_v11, %v285_v33 }
 0x157   :  { %294 = vst [vmem:[#allocation9] sm:$0xff] %v291_v37 }
 0x158   :  { %309 = dma.vmem_to_hbm [thread:$0]  %s302_s10, 384, %s304_s13, [#allocation4], %s466_s24, %s466_s24, %s467_s25  }
 0x159   :  { %462 = dma.done.wait [#allocation4], 384  }
 0x15a   :  { %463 = vsyncadd [#allocation4], 4294966912 }
 0x15b   :  { %314 = vsyncpa [#allocation3], 1 }
 0x15c   :  { %315 = vsyncpa [#allocation8], 1 }
 0x15d   :  { %316 = vsyncpa [#allocation4], 1 }
 0x15e   :  { %317 = vsyncpa [#allocation5], 1 }

</bundles_post_ra>
